<compile_context>
chip_gen: v7x
topology: tpu7x:2x2x1
jax: 0.10.0
libtpu: 0.0.40
codegen_flags: <defaults>
</compile_context>

<pallas_src>
import functools

import jax
import jax.numpy as jnp
from jax.experimental import pallas as pl
from jax.experimental.pallas import tpu as pltpu


def _round_up(x, m):
    return ((x + m - 1) // m) * m


def _watermarked_likelihood_kernel(g_ref, p_ref, out_ref, *, depth):
    """One (TM, 128) tile.

    g_ref:   (TM, 128) wire dtype; G tokens of Lp lanes each, values in {0,1}.
    p_ref:   (depth, 128) f32.  Row 0 = lane-replicated beta; row s (s>=1) =
             lane-replicated strict-lower-tri coefficients delta[i, i-s]
             (zero where i < s and on pad lanes) -> no cross-token leakage.
    out_ref: (TM, 128) output dtype.
    """
    g = g_ref[...].astype(jnp.float32)            # exact for {0,1}
    logits = p_ref[0:1, :]                        # beta, broadcasts over rows
    for s in range(1, depth):                     # static unroll: depth-1 rolls
        # roll(g, s)[:, l] == g[:, l-s]: the g-value of position i-s in the
        # same token slot; wrapped / cross-slot lanes have a zero coefficient.
        logits = logits + p_ref[s:s + 1, :] * pltpu.roll(g, shift=s, axis=1)
    p_two = jax.nn.sigmoid(logits)
    # 0.5*((g+0.5)*p_two + (1-p_two)) == 0.5 + (0.5*g - 0.25)*p_two
    out_ref[...] = (0.5 + (0.5 * g - 0.25) * p_two).astype(out_ref.dtype)


@functools.partial(jax.jit, static_argnames=("tm", "out_dtype"))
def bayesian_detector_watermarked_likelihood(g_values, beta, delta, *,
                                             tm=4096, out_dtype=jnp.float32):
    """g_values: (B, T, L) any numeric dtype (values {0,1}); beta: (1,1,L);
    delta: (1,1,L,L).  Returns p(g|watermarked) of shape (B, T, L)."""
    B, T, L = g_values.shape
    M = B * T
    if L > 128:
        # TODO(synk): watermarking_depth > 128 would need tiling the depth axis.
        raise NotImplementedError("watermarking_depth > 128 not supported")

    # Lane-dense packing: Lp is a power of two so it divides 128 exactly.
    Lp = pl.next_power_of_2(L)
    G = 128 // Lp
    GL = G * Lp                                   # always 128

    # Per-lane parameters (exact f32): row 0 = beta, row s = delta[i, i-s] for
    # i >= s (strict lower triangle), zero elsewhere / on pad lanes.
    delta2d = delta.reshape(L, L).astype(jnp.float32)
    beta1d = beta.reshape(L).astype(jnp.float32)
    tail = jnp.zeros((Lp - L,), jnp.float32)
    rows = [jnp.concatenate([beta1d, tail])]
    for s in range(1, L):
        rows.append(jnp.concatenate(
            [jnp.zeros((s,), jnp.float32), jnp.diag(delta2d, k=-s), tail]))
    params = jnp.tile(jnp.stack(rows), (1, G))    # (L, 128), resident in VMEM

    # Pack G tokens per 128-lane row, keeping the wire dtype (no f32 upcast).
    g_flat = g_values.reshape(M, L)
    pad_rows = (-M) % G
    if pad_rows or Lp != L:
        g_flat = jnp.pad(g_flat, ((0, pad_rows), (0, Lp - L)))
    m_pack = (M + pad_rows) // G
    g_packed = g_flat.reshape(m_pack, GL)

    # Row tile: native sublane multiple of the wire dtype (8 f32 / 16 bf16 /
    # 32 int8), >= 4 grid steps when possible (v7x megacore), never larger
    # than the array (tiny inputs use one exact full-array tile).
    sub = max(8, 32 // jnp.dtype(g_values.dtype).itemsize)
    if m_pack <= sub:
        tm_eff = m_pack
    else:
        tm_eff = max(sub, min(tm, _round_up(pl.cdiv(m_pack, 4), sub)))
    grid = (pl.cdiv(m_pack, tm_eff),)             # ragged last tile handled by Pallas

    out_packed = pl.pallas_call(
        functools.partial(_watermarked_likelihood_kernel, depth=L),
        out_shape=jax.ShapeDtypeStruct((m_pack, GL), out_dtype),
        grid=grid,
        in_specs=[
            pl.BlockSpec((tm_eff, GL), lambda i: (i, 0)),   # streamed g tiles
            pl.BlockSpec((L, GL), lambda i: (0, 0)),        # resident params
        ],
        out_specs=pl.BlockSpec((tm_eff, GL), lambda i: (i, 0)),
        compiler_params=pltpu.CompilerParams(
            dimension_semantics=("parallel",),              # megacore on v7x
            vmem_limit_bytes=32 * 1024 * 1024),
    )(g_packed, params)

    out = out_packed.reshape(m_pack * G, Lp)
    if Lp != L:
        out = out[:, :L]
    if pad_rows:
        out = out[:M]
    return out.reshape(B, T, L)


def _reference(g_values, beta, delta):
    """Pure-JAX reference mirroring the PyTorch module (f32)."""
    B, T, L = g_values.shape
    g = g_values.astype(jnp.float32)
    x = jnp.broadcast_to(g[:, :, None, :], (B, T, L, L))
    mask = jnp.tril(jnp.ones((L, L), dtype=bool), k=-1)
    x = jnp.where(mask, x, 0.0)
    logits = jnp.einsum("ij,btij->bti", delta.reshape(L, L).astype(jnp.float32), x)
    logits = logits + beta.reshape(1, 1, L).astype(jnp.float32)
    p_two = jax.nn.sigmoid(logits)
    return 0.5 * ((g + 0.5) * p_two + (1.0 - p_two))


if __name__ == "__main__":
    watermarking_depth = 4
    B, T, L = 2, 8, watermarking_depth

    key = jax.random.PRNGKey(0)
    k_beta, k_delta, k_g = jax.random.split(key, 3)

    # Deterministic synthetic parameters matching the module's __init__ shapes.
    beta = -2.5 + 0.001 * jax.random.normal(k_beta, (1, 1, L), dtype=jnp.float32)
    delta = 0.001 * jax.random.normal(k_delta, (1, 1, L, L), dtype=jnp.float32)

    # Binary g-values shipped as int8: exact {0,1}, 4x fewer HBM read bytes.
    g_values = jax.random.bernoulli(k_g, p=0.5, shape=(B, T, L)).astype(jnp.int8)

    out = bayesian_detector_watermarked_likelihood(g_values, beta, delta)
    out = jax.block_until_ready(out)

    ref = _reference(g_values, beta, delta)
    assert out.shape == (B, T, L)
    assert out.dtype == jnp.float32
    assert jnp.allclose(out, ref, atol=1e-5, rtol=1e-5), "mismatch vs reference"

    print("KERNEL_OK")
</pallas_src>

<mosaic_0001>
module attributes {stable_mosaic.version = 11 : i64} {
  func.func @_watermarked_likelihood_kernel(%arg0: i32, %arg1: memref<1x128xi8, #tpu.memory_space<vmem>>, %arg2: memref<4x128xf32, #tpu.memory_space<vmem>>, %arg3: memref<1x128xf32, #tpu.memory_space<vmem>>) attributes {dimension_semantics = [#tpu.dimension_semantics<parallel>], iteration_bounds = array<i64: 1>, scalar_prefetch = 0 : i64, scratch_operands = 0 : i64, tpu.core_type = #tpu.core_type<tc>, window_params = [{transform_indices = @transform_0, window_bounds = array<i64: 1, 128>}, {pipeline_mode = #tpu.pipeline_mode<synchronous>, transform_indices = @transform_1, window_bounds = array<i64: 4, 128>}, {transform_indices = @transform_2, window_bounds = array<i64: 1, 128>}]} {
    %c0 = arith.constant 0 : index
    %c0_0 = arith.constant 0 : index
    %0 = vector.load %arg1[%c0, %c0_0] : memref<1x128xi8, #tpu.memory_space<vmem>>, vector<1x128xi8>
    %1 = arith.sitofp %0 : vector<1x128xi8> to vector<1x128xf32>
    %c0_1 = arith.constant 0 : index
    %c0_2 = arith.constant 0 : index
    %2 = vector.load %arg2[%c0_1, %c0_2] : memref<4x128xf32, #tpu.memory_space<vmem>>, vector<1x128xf32>
    %c1 = arith.constant 1 : index
    %c0_3 = arith.constant 0 : index
    %3 = vector.load %arg2[%c1, %c0_3] : memref<4x128xf32, #tpu.memory_space<vmem>>, vector<1x128xf32>
    %c1_i32 = arith.constant 1 : i32
    %4 = tpu.dynamic_rotate %1 by %c1_i32 dim 1 : vector<1x128xf32>, i32 -> vector<1x128xf32>
    %5 = arith.mulf %3, %4 : vector<1x128xf32>
    %6 = arith.addf %2, %5 : vector<1x128xf32>
    %c2 = arith.constant 2 : index
    %c0_4 = arith.constant 0 : index
    %7 = vector.load %arg2[%c2, %c0_4] : memref<4x128xf32, #tpu.memory_space<vmem>>, vector<1x128xf32>
    %c2_i32 = arith.constant 2 : i32
    %8 = tpu.dynamic_rotate %1 by %c2_i32 dim 1 : vector<1x128xf32>, i32 -> vector<1x128xf32>
    %9 = arith.mulf %7, %8 : vector<1x128xf32>
    %10 = arith.addf %6, %9 : vector<1x128xf32>
    %c3 = arith.constant 3 : index
    %c0_5 = arith.constant 0 : index
    %11 = vector.load %arg2[%c3, %c0_5] : memref<4x128xf32, #tpu.memory_space<vmem>>, vector<1x128xf32>
    %c3_i32 = arith.constant 3 : i32
    %12 = tpu.dynamic_rotate %1 by %c3_i32 dim 1 : vector<1x128xf32>, i32 -> vector<1x128xf32>
    %13 = arith.mulf %11, %12 : vector<1x128xf32>
    %14 = arith.addf %10, %13 : vector<1x128xf32>
    %15 = arith.negf %14 : vector<1x128xf32>
    %16 = math.exp %15 : vector<1x128xf32>
    %cst = arith.constant 1.000000e+00 : f32
    %17 = vector.broadcast %cst : f32 to vector<1x128xf32>
    %18 = arith.addf %17, %16 : vector<1x128xf32>
    %19 = arith.divf %17, %18 : vector<1x128xf32>
    %cst_6 = arith.constant 5.000000e-01 : f32
    %20 = vector.broadcast %cst_6 : f32 to vector<1x128xf32>
    %21 = arith.mulf %20, %1 : vector<1x128xf32>
    %cst_7 = arith.constant 2.500000e-01 : f32
    %22 = vector.broadcast %cst_7 : f32 to vector<1x128xf32>
    %23 = arith.subf %21, %22 : vector<1x128xf32>
    %24 = arith.mulf %23, %19 : vector<1x128xf32>
    %cst_8 = arith.constant 5.000000e-01 : f32
    %25 = vector.broadcast %cst_8 : f32 to vector<1x128xf32>
    %26 = arith.addf %25, %24 : vector<1x128xf32>
    %c0_9 = arith.constant 0 : index
    %c0_10 = arith.constant 0 : index
    %27 = vector.load %arg3[%c0_9, %c0_10] : memref<1x128xf32, #tpu.memory_space<vmem>>, vector<1x128xf32>
    tpu.vector_store %arg3[%c0_9, %c0_10], %26 {strides = array<i32>} : memref<1x128xf32, #tpu.memory_space<vmem>>, vector<1x128xf32>,
    return
  }
  func.func @transform_0(%arg0: i32) -> (i32, i32) {
    %c0_i32 = arith.constant 0 : i32
    %c0_i32_0 = arith.constant 0 : i32
    return %arg0, %c0_i32 : i32, i32
  }
  func.func @transform_1(%arg0: i32) -> (i32, i32) {
    %c0_i32 = arith.constant 0 : i32
    %c0_i32_0 = arith.constant 0 : i32
    %c0_i32_1 = arith.constant 0 : i32
    return %c0_i32, %c0_i32_0 : i32, i32
  }
  func.func @transform_2(%arg0: i32) -> (i32, i32) {
    %c0_i32 = arith.constant 0 : i32
    %c0_i32_0 = arith.constant 0 : i32
    return %arg0, %c0_i32 : i32, i32
  }
}

</mosaic_0001>

<bundles_post_ra>
// kernel: tile.9
= control target key start
LH: loop header
LB: loop body
LE: loop exit
PB: predicated region body
PF: predicated region fallthrough
CT: control target
= control target key end

     0   :  { %vm5_vm0 = vcmask 1041409   ;;  %vm9_vm1 = vcmask 1042434   ;;  %vm13_vm2 = vcmask 1043459   ;;  %s739_s30 = smov 124   ;;  %s740_s8 = smov 116   ;;  %vm15_vm3 = vcmask 31744   ;;  %s1264_s0 = inlined_call_operand.vmem [shape: f32[4,32,4], index: 0, kind: input, shape index: {}]   ;;  %s1265_s1 = inlined_call_operand.vmem [shape: f32[4,128], index: 1, kind: output, shape index: {}]  }
   0x1   :  { %v584_v0 = vld [vmem:[%s1264_s0 + $0x1f] sm:$0x1]   ;;  %v592_v5 = vld [vmem:[%s1264_s0 + $0x1d] sm:$0x1]   ;;  %v588_v11 = vld [vmem:[%s1264_s0 + $0x1e] sm:$0x1]  }
   0x2   :  { %v585_v1 = vld [vmem:[%s1264_s0 + $0x3e] sm:$0x2]   ;;  %v593_v6 = vld [vmem:[%s1264_s0 + $0x3c] sm:$0x2]   ;;  %v589_v14 = vld [vmem:[%s1264_s0 + $0x3d] sm:$0x2]  }
   0x3   :  { %v586_v2 = vld [vmem:[%s1264_s0 + $0x5d] sm:$0x4]   ;;  %v22_v4 = vsel %vm5_vm0, %v585_v1, %v584_v0  ;;  %v594_v7 = vld [vmem:[%s1264_s0 + $0x5b] sm:$0x4]   ;;  %v58_v9 = vsel %vm5_vm0, %v593_v6, %v592_v5  ;;  %v590_v15 = vld [vmem:[%s1264_s0 + $0x5c] sm:$0x4]   ;;  %v40_v18 = vsel %vm5_vm0, %v589_v14, %v588_v11 }
   0x4   :  { %v587_v3 = vld [vmem:[%s1264_s0 + $0x7c] sm:$0x8]   ;;  %v26_v8 = vsel %vm9_vm1, %v586_v2, %v22_v4  ;;  %v595_v10 = vld [vmem:[%s1264_s0 + $0x7a] sm:$0x8]   ;;  %v62_v13 = vsel %vm9_vm1, %v594_v7, %v58_v9  ;;  %v591_v16 = vld [vmem:[%s1264_s0 + $0x7b] sm:$0x8]   ;;  %v44_v22 = vsel %vm9_vm1, %v590_v15, %v40_v18 }
   0x5   :  { %v30_v12 = vsel %vm13_vm2, %v587_v3, %v26_v8  ;;  %v66_v17 = vsel %vm13_vm2, %v595_v10, %v62_v13  ;;  %v596_v19 = vld [vmem:[%s1264_s0 + $0x1c] sm:$0x1]   ;;  %v600_v25 = vld [vmem:[%s1264_s0 + $0x1b] sm:$0x1]   ;;  %v48_v26 = vsel %vm13_vm2, %v591_v16, %v44_v22  ;;  %v604_v33 = vld [vmem:[%s1264_s0 + $0x1a] sm:$0x1]  }
   0x6   :  { %31 = vrot.lane.b32.xlu0 %v30_v12, %s739_s30  ;;  %v597_v20 = vld [vmem:[%s1264_s0 + $0x3b] sm:$0x2]   ;;  %67 = vrot.lane.b32.xlu1 %v66_v17, %s740_s8  ;;  %v601_v28 = vld [vmem:[%s1264_s0 + $0x3a] sm:$0x2]   ;;  %s741_s25 = smov 120   ;;  %s742_s30 = smov 112  }
   0x7   :  { %v598_v21 = vld [vmem:[%s1264_s0 + $0x5a] sm:$0x4]   ;;  %v76_v23 = vsel %vm5_vm0, %v597_v20, %v596_v19  ;;  %v602_v29 = vld [vmem:[%s1264_s0 + $0x59] sm:$0x4]   ;;  %v94_v32 = vsel %vm5_vm0, %v601_v28, %v600_v25  ;;  %v605_v34 = vld [vmem:[%s1264_s0 + $0x39] sm:$0x2]  }
   0x8   :  { %v599_v24 = vld [vmem:[%s1264_s0 + $0x79] sm:$0x8]   ;;  %v80_v27 = vsel %vm9_vm1, %v598_v21, %v76_v23  ;;  %v603_v30 = vld [vmem:[%s1264_s0 + $0x78] sm:$0x8]   ;;  %v606_v35 = vld [vmem:[%s1264_s0 + $0x58] sm:$0x4]   ;;  %v98_v36 = vsel %vm9_vm1, %v602_v29, %v94_v32  ;;  %v112_v37 = vsel %vm5_vm0, %v605_v34, %v604_v33 }
   0x9   :  { %v84_v31 = vsel %vm13_vm2, %v599_v24, %v80_v27  ;;  %v607_v38 = vld [vmem:[%s1264_s0 + $0x77] sm:$0x8]   ;;  %v608_v39 = vld [vmem:[%s1264_s0 + $0x19] sm:$0x1]   ;;  %v102_v40 = vsel %vm13_vm2, %v603_v30, %v98_v36  ;;  %v116_v41 = vsel %vm9_vm1, %v606_v35, %v112_v37  ;;  %v612_v47 = vld [vmem:[%s1264_s0 + $0x18] sm:$0x1]  }
   0xa   :  { %49 = vrot.lane.b32.xlu0 %v48_v26, %s741_s25  ;;  %85 = vrot.lane.b32.xlu1 %v84_v31, %s742_s30  ;;  %v609_v42 = vld [vmem:[%s1264_s0 + $0x38] sm:$0x2]   ;;  %v120_v45 = vsel %vm13_vm2, %v607_v38, %v116_v41  ;;  %v613_v48 = vld [vmem:[%s1264_s0 + $0x37] sm:$0x2]   ;;  %s743_s18 = smov 108   ;;  %s744_s23 = smov 104  }
   0xb   :  { %v610_v43 = vld [vmem:[%s1264_s0 + $0x57] sm:$0x4]   ;;  %v130_v46 = vsel %vm5_vm0, %v609_v42, %v608_v39  ;;  %v614_v49 = vld [vmem:[%s1264_s0 + $0x56] sm:$0x4]   ;;  %v148_v51 = vsel %vm5_vm0, %v613_v48, %v612_v47  ;;  %v616_v53 = vld [vmem:[%s1264_s0 + $0x17] sm:$0x1]  }
   0xc   :  { %v611_v44 = vld [vmem:[%s1264_s0 + $0x76] sm:$0x8]   ;;  %v134_v50 = vsel %vm9_vm1, %v610_v43, %v130_v46  ;;  %v615_v52 = vld [vmem:[%s1264_s0 + $0x75] sm:$0x8]   ;;  %v152_v54 = vsel %vm9_vm1, %v614_v49, %v148_v51  ;;  %v617_v55 = vld [vmem:[%s1264_s0 + $0x36] sm:$0x2]  }
   0xd   :  { %v618_v56 = vld [vmem:[%s1264_s0 + $0x55] sm:$0x4]   ;;  %v138_v57 = vsel %vm13_vm2, %v611_v44, %v134_v50  ;;  %v166_v58 = vsel %vm5_vm0, %v617_v55, %v616_v53  ;;  %v620_v59 = vld [vmem:[%s1264_s0 + $0x16] sm:$0x1]   ;;  %v156_v62 = vsel %vm13_vm2, %v615_v52, %v152_v54  ;;  %v624_v2 = vld [vmem:[%s1264_s0 + $0x15] sm:$0x1]  }
   0xe   :  { %103 = vrot.lane.b32.xlu0 %v102_v40, %s743_s18  ;;  %121 = vrot.lane.b32.xlu1 %v120_v45, %s744_s23  ;;  %v621_v60 = vld [vmem:[%s1264_s0 + $0x35] sm:$0x2]   ;;  %v170_v63 = vsel %vm9_vm1, %v618_v56, %v166_v58  ;;  %v619_v0 = vld [vmem:[%s1264_s0 + $0x74] sm:$0x8]   ;;  %s745_s11 = smov 100   ;;  %s746_s18 = smov 96  }
   0xf   :  { %v622_v61 = vld [vmem:[%s1264_s0 + $0x54] sm:$0x4]   ;;  %v184_v1 = vsel %vm5_vm0, %v621_v60, %v620_v59  ;;  %v625_v5 = vld [vmem:[%s1264_s0 + $0x34] sm:$0x2]   ;;  %v628_v8 = vld [vmem:[%s1264_s0 + $0x14] sm:$0x1]   ;;  %v174_v11 = vsel %vm13_vm2, %v619_v0, %v170_v63 }
  0x10   :  { %v188_v3 = vsel %vm9_vm1, %v622_v61, %v184_v1  ;;  %v623_v4 = vld [vmem:[%s1264_s0 + $0x73] sm:$0x8]   ;;  %v626_v6 = vld [vmem:[%s1264_s0 + $0x53] sm:$0x4]   ;;  %v202_v7 = vsel %vm5_vm0, %v625_v5, %v624_v2  ;;  %v629_v9 = vld [vmem:[%s1264_s0 + $0x33] sm:$0x2]  }
  0x11   :  { %v630_v10 = vld [vmem:[%s1264_s0 + $0x52] sm:$0x4]   ;;  %v220_v12 = vsel %vm5_vm0, %v629_v9, %v628_v8  ;;  %v632_v13 = vld [vmem:[%s1264_s0 + $0x13] sm:$0x1]   ;;  %v192_v14 = vsel %vm13_vm2, %v623_v4, %v188_v3  ;;  %v206_v15 = vsel %vm9_vm1, %v626_v6, %v202_v7  ;;  %v627_v16 = vld [vmem:[%s1264_s0 + $0x72] sm:$0x8]  }
  0x12   :  { %139 = vrot.lane.b32.xlu0 %v138_v57, %s745_s11  ;;  %157 = vrot.lane.b32.xlu1 %v156_v62, %s746_s18  ;;  %v631_v17 = vld [vmem:[%s1264_s0 + $0x71] sm:$0x8]   ;;  %v633_v18 = vld [vmem:[%s1264_s0 + $0x32] sm:$0x2]   ;;  %v224_v19 = vsel %vm9_vm1, %v630_v10, %v220_v12  ;;  %s747_s4 = smov 92   ;;  %s748_s9 = smov 88   ;;  %v210_v27 = vsel %vm13_vm2, %v627_v16, %v206_v15 }
  0x13   :  { %v238_v20 = vsel %vm5_vm0, %v633_v18, %v632_v13  ;;  %v634_v21 = vld [vmem:[%s1264_s0 + $0x51] sm:$0x4]   ;;  %v636_v22 = vld [vmem:[%s1264_s0 + $0x12] sm:$0x1]   ;;  %v640_v26 = vld [vmem:[%s1264_s0 + $0x11] sm:$0x1]   ;;  %v228_v29 = vsel %vm13_vm2, %v631_v17, %v224_v19 }
  0x14   :  { %v637_v23 = vld [vmem:[%s1264_s0 + $0x31] sm:$0x2]   ;;  %v641_v28 = vld [vmem:[%s1264_s0 + $0x30] sm:$0x2]   ;;  %v242_v30 = vsel %vm9_vm1, %v634_v21, %v238_v20  ;;  %v635_v31 = vld [vmem:[%s1264_s0 + $0x70] sm:$0x8]  }
  0x15   :  { %v256_v24 = vsel %vm5_vm0, %v637_v23, %v636_v22  ;;  %v638_v25 = vld [vmem:[%s1264_s0 + $0x50] sm:$0x4]   ;;  %v644_v32 = vld [vmem:[%s1264_s0 + $0x10] sm:$0x1]   ;;  %v274_v36 = vsel %vm5_vm0, %v641_v28, %v640_v26  ;;  %v642_v37 = vld [vmem:[%s1264_s0 + $0x4f] sm:$0x4]   ;;  %v246_v42 = vsel %vm13_vm2, %v635_v31, %v242_v30 }
  0x16   :  { %175 = vrot.lane.b32.xlu0 %v174_v11, %s747_s4  ;;  %193 = vrot.lane.b32.xlu1 %v192_v14, %s748_s9  ;;  %v645_v33 = vld [vmem:[%s1264_s0 + $0x2f] sm:$0x2]   ;;  %v260_v34 = vsel %vm9_vm1, %v638_v25, %v256_v24  ;;  %v639_v35 = vld [vmem:[%s1264_s0 + $0x6f] sm:$0x8]   ;;  %s749_s22 = smov 84   ;;  %s750_s29 = smov 80   ;;  %v278_v46 = vsel %vm9_vm1, %v642_v37, %v274_v36 }
  0x17   :  { %v292_v38 = vsel %vm5_vm0, %v645_v33, %v644_v32  ;;  %v646_v39 = vld [vmem:[%s1264_s0 + $0x4e] sm:$0x4]   ;;  %v648_v40 = vld [vmem:[%s1264_s0 + $0xf] sm:$0x1]   ;;  %v652_v43 = vld [vmem:[%s1264_s0 + $0xe] sm:$0x1]   ;;  %v264_v45 = vsel %vm13_vm2, %v639_v35, %v260_v34 }
  0x18   :  { %v649_v41 = vld [vmem:[%s1264_s0 + $0x2e] sm:$0x2]   ;;  %v653_v44 = vld [vmem:[%s1264_s0 + $0x2d] sm:$0x2]   ;;  %v643_v47 = vld [vmem:[%s1264_s0 + $0x6e] sm:$0x8]   ;;  %v296_v48 = vsel %vm9_vm1, %v646_v39, %v292_v38 }
  0x19   :  { %v647_v49 = vld [vmem:[%s1264_s0 + $0x6d] sm:$0x8]   ;;  %v310_v50 = vsel %vm5_vm0, %v649_v41, %v648_v40  ;;  %v650_v51 = vld [vmem:[%s1264_s0 + $0x4d] sm:$0x4]   ;;  %s751_s11 = smov 76   ;;  %v328_v52 = vsel %vm5_vm0, %v653_v44, %v652_v43  ;;  %s752_s18 = smov 72   ;;  %v282_v56 = vsel %vm13_vm2, %v643_v47, %v278_v46 }
  0x1a   :  { %211 = vrot.lane.b32.xlu0 %v210_v27, %s749_s22  ;;  %229 = vrot.lane.b32.xlu1 %v228_v29, %s750_s29  ;;  %v654_v53 = vld [vmem:[%s1264_s0 + $0x4c] sm:$0x4]   ;;  %v656_v54 = vld [vmem:[%s1264_s0 + $0xd] sm:$0x1]   ;;  %v300_v59 = vsel %vm13_vm2, %v647_v49, %v296_v48  ;;  %v314_v60 = vsel %vm9_vm1, %v650_v51, %v310_v50  ;;  %s753_s29 = smov 68   ;;  %s754_s7 = smov 64  }
  0x1b   :  { %v657_v55 = vld [vmem:[%s1264_s0 + $0x2c] sm:$0x2]   ;;  %v660_v57 = vld [vmem:[%s1264_s0 + $0xc] sm:$0x1]   ;;  %v651_v61 = vld [vmem:[%s1264_s0 + $0x6c] sm:$0x8]   ;;  %v332_v62 = vsel %vm9_vm1, %v654_v53, %v328_v52 }
  0x1c   :  { %v661_v58 = vld [vmem:[%s1264_s0 + $0x2b] sm:$0x2]   ;;  %v655_v63 = vld [vmem:[%s1264_s0 + $0x6b] sm:$0x8]   ;;  %v346_v0 = vsel %vm5_vm0, %v657_v55, %v656_v54  ;;  %v658_v1 = vld [vmem:[%s1264_s0 + $0x4b] sm:$0x4]   ;;  %v318_v6 = vsel %vm13_vm2, %v651_v61, %v314_v60 }
  0x1d   :  { %v364_v2 = vsel %vm5_vm0, %v661_v58, %v660_v57  ;;  %v662_v3 = vld [vmem:[%s1264_s0 + $0x4a] sm:$0x4]   ;;  %v664_v4 = vld [vmem:[%s1264_s0 + $0xb] sm:$0x1]   ;;  %v668_v7 = vld [vmem:[%s1264_s0 + $0xa] sm:$0x1]   ;;  %v336_v9 = vsel %vm13_vm2, %v655_v63, %v332_v62  ;;  %v350_v10 = vsel %vm9_vm1, %v658_v1, %v346_v0 }
  0x1e   :  { %247 = vrot.lane.b32.xlu0 %v246_v42, %s751_s11  ;;  %265 = vrot.lane.b32.xlu1 %v264_v45, %s752_s18  ;;  %v665_v5 = vld [vmem:[%s1264_s0 + $0x2a] sm:$0x2]   ;;  %v669_v8 = vld [vmem:[%s1264_s0 + $0x29] sm:$0x2]   ;;  %v368_v12 = vsel %vm9_vm1, %v662_v3, %v364_v2  ;;  %s755_s18 = smov 60   ;;  %s756_s25 = smov 56  }
  0x1f   :  { %v659_v11 = vld [vmem:[%s1264_s0 + $0x6a] sm:$0x8]   ;;  %v663_v13 = vld [vmem:[%s1264_s0 + $0x69] sm:$0x8]   ;;  %v382_v14 = vsel %vm5_vm0, %v665_v5, %v664_v4  ;;  %v666_v15 = vld [vmem:[%s1264_s0 + $0x49] sm:$0x4]   ;;  %v400_v16 = vsel %vm5_vm0, %v669_v8, %v668_v7 }
  0x20   :  { %v670_v17 = vld [vmem:[%s1264_s0 + $0x48] sm:$0x4]   ;;  %v672_v18 = vld [vmem:[%s1264_s0 + $0x9] sm:$0x1]   ;;  %v354_v20 = vsel %vm13_vm2, %v659_v11, %v350_v10  ;;  %v676_v21 = vld [vmem:[%s1264_s0 + $0x8] sm:$0x1]   ;;  %v372_v23 = vsel %vm13_vm2, %v663_v13, %v368_v12  ;;  %v386_v24 = vsel %vm9_vm1, %v666_v15, %v382_v14 }
  0x21   :  { %v673_v19 = vld [vmem:[%s1264_s0 + $0x28] sm:$0x2]   ;;  %v677_v22 = vld [vmem:[%s1264_s0 + $0x27] sm:$0x2]   ;;  %v667_v25 = vld [vmem:[%s1264_s0 + $0x68] sm:$0x8]   ;;  %v404_v26 = vsel %vm9_vm1, %v670_v17, %v400_v16 }
  0x22   :  { %283 = vrot.lane.b32.xlu0 %v282_v56, %s753_s29  ;;  %301 = vrot.lane.b32.xlu1 %v300_v59, %s754_s7  ;;  %v671_v27 = vld [vmem:[%s1264_s0 + $0x67] sm:$0x8]   ;;  %v418_v28 = vsel %vm5_vm0, %v673_v19, %v672_v18  ;;  %v674_v29 = vld [vmem:[%s1264_s0 + $0x47] sm:$0x4]   ;;  %s757_s7 = smov 52   ;;  %v436_v30 = vsel %vm5_vm0, %v677_v22, %v676_v21  ;;  %s758_s14 = smov 48   ;;  %v390_v34 = vsel %vm13_vm2, %v667_v25, %v386_v24 }
  0x23   :  { %v678_v31 = vld [vmem:[%s1264_s0 + $0x46] sm:$0x4]   ;;  %v680_v32 = vld [vmem:[%s1264_s0 + $0x7] sm:$0x1]   ;;  %v684_v35 = vld [vmem:[%s1264_s0 + $0x6] sm:$0x1]   ;;  %v408_v37 = vsel %vm13_vm2, %v671_v27, %v404_v26  ;;  %v422_v38 = vsel %vm9_vm1, %v674_v29, %v418_v28 }
  0x24   :  { %v681_v33 = vld [vmem:[%s1264_s0 + $0x26] sm:$0x2]   ;;  %v685_v36 = vld [vmem:[%s1264_s0 + $0x25] sm:$0x2]   ;;  %v675_v39 = vld [vmem:[%s1264_s0 + $0x66] sm:$0x8]   ;;  %v440_v40 = vsel %vm9_vm1, %v678_v31, %v436_v30 }
  0x25   :  { %v679_v41 = vld [vmem:[%s1264_s0 + $0x65] sm:$0x8]   ;;  %v454_v42 = vsel %vm5_vm0, %v681_v33, %v680_v32  ;;  %v682_v43 = vld [vmem:[%s1264_s0 + $0x45] sm:$0x4]   ;;  %v472_v45 = vsel %vm5_vm0, %v685_v36, %v684_v35  ;;  %v686_v46 = vld [vmem:[%s1264_s0 + $0x44] sm:$0x4]   ;;  %v426_v49 = vsel %vm13_vm2, %v675_v39, %v422_v38 }
  0x26   :  { %319 = vrot.lane.b32.xlu0 %v318_v6, %s755_s18  ;;  %337 = vrot.lane.b32.xlu1 %v336_v9, %s756_s25  ;;  %s759_s25 = smov 44   ;;  %v683_v44 = vld [vmem:[%s1264_s0 + $0x64] sm:$0x8]   ;;  %v688_v47 = vld [vmem:[%s1264_s0 + $0x5] sm:$0x1]   ;;  %s760_s5 = smov 40   ;;  %v444_v53 = vsel %vm13_vm2, %v679_v41, %v440_v40  ;;  %v458_v54 = vsel %vm9_vm1, %v682_v43, %v454_v42  ;;  %v476_v58 = vsel %vm9_vm1, %v686_v46, %v472_v45 }
  0x27   :  { %v689_v48 = vld [vmem:[%s1264_s0 + $0x24] sm:$0x2]   ;;  %v687_v50 = vld [vmem:[%s1264_s0 + $0x63] sm:$0x8]   ;;  %v692_v51 = vld [vmem:[%s1264_s0 + $0x4] sm:$0x1]   ;;  %v462_v3 = vsel %vm13_vm2, %v683_v44, %v458_v54 }
  0x28   :  { %v693_v52 = vld [vmem:[%s1264_s0 + $0x23] sm:$0x2]   ;;  %v690_v55 = vld [vmem:[%s1264_s0 + $0x43] sm:$0x4]   ;;  %v582_v57 = vld [vmem:[%s1264_s0 + $0x3e] sm:$0x4]   ;;  %v490_v59 = vsel %vm5_vm0, %v689_v48, %v688_v47  ;;  %v480_v7 = vsel %vm13_vm2, %v687_v50, %v476_v58 }
  0x29   :  { %v694_v56 = vld [vmem:[%s1264_s0 + $0x42] sm:$0x4]   ;;  %v583_v60 = vld [vmem:[%s1264_s0 + $0x5d] sm:$0x8]   ;;  %s761_s24 = smov 36   ;;  %v508_v63 = vsel %vm5_vm0, %v693_v52, %v692_v51  ;;  %s762_s29 = smov 32   ;;  %v494_v8 = vsel %vm9_vm1, %v690_v55, %v490_v59 }
  0x2a   :  { %355 = vrot.lane.b32.xlu0 %v354_v20, %s757_s7  ;;  %373 = vrot.lane.b32.xlu1 %v372_v23, %s758_s14  ;;  %v2_v61 = vld [vmem:[%s1264_s0] sm:$0x1]   ;;  %v696_v0 = vld [vmem:[%s1264_s0 + $0x3] sm:$0x1]   ;;  %v512_v11 = vsel %vm9_vm1, %v694_v56, %v508_v63  ;;  %s763_s11 = smov 28   ;;  %s764_s18 = smov 24  }
  0x2b   :  { %v581_v62 = vld [vmem:[%s1264_s0 + $0x1f] sm:$0x2]   ;;  %v697_v1 = vld [vmem:[%s1264_s0 + $0x22] sm:$0x2]   ;;  %v700_v4 = vld [vmem:[%s1264_s0 + $0x2] sm:$0x1]  }
  0x2c   :  { %v6_v2 = vsel %vm5_vm0, %v581_v62, %v2_v61  ;;  %v701_v5 = vld [vmem:[%s1264_s0 + $0x21] sm:$0x2]   ;;  %v691_v9 = vld [vmem:[%s1264_s0 + $0x62] sm:$0x8]   ;;  %v695_v12 = vld [vmem:[%s1264_s0 + $0x61] sm:$0x8]   ;;  %v526_v13 = vsel %vm5_vm0, %v697_v1, %v696_v0 }
  0x2d   :  { %v10_v6 = vsel %vm9_vm1, %v582_v57, %v6_v2  ;;  %v698_v14 = vld [vmem:[%s1264_s0 + $0x41] sm:$0x4]   ;;  %v544_v15 = vsel %vm5_vm0, %v701_v5, %v700_v4  ;;  %v702_v16 = vld [vmem:[%s1264_s0 + $0x40] sm:$0x4]   ;;  %v704_v17 = vld [vmem:[%s1264_s0 + $0x1] sm:$0x1]   ;;  %v498_v19 = vsel %vm13_vm2, %v691_v9, %v494_v8  ;;  %v516_v20 = vsel %vm13_vm2, %v695_v12, %v512_v11 }
  0x2e   :  { %391 = vrot.lane.b32.xlu0 %v390_v34, %s759_s25  ;;  %409 = vrot.lane.b32.xlu1 %v408_v37, %s760_s5  ;;  %v14_v10 = vsel %vm13_vm2, %v583_v60, %v10_v6  ;;  %v705_v18 = vld [vmem:[%s1264_s0 + $0x20] sm:$0x2]   ;;  %v530_v21 = vsel %vm9_vm1, %v698_v14, %v526_v13  ;;  %v699_v22 = vld [vmem:[%s1264_s0 + $0x60] sm:$0x8]   ;;  %v548_v23 = vsel %vm9_vm1, %v702_v16, %v544_v15  ;;  %s765_s25 = smov 20   ;;  %s766_s26 = smov 16  }
  0x2f   :  { %16 = vst.msk [vmem:[#allocation0] sm:$0xf] %vm15_vm3, %v14_v10   ;;  %v703_v24 = vld [vmem:[%s1264_s0 + $0x5f] sm:$0x8]   ;;  %v562_v25 = vsel %vm5_vm0, %v705_v18, %v704_v17  ;;  %v706_v26 = vld [vmem:[%s1264_s0 + $0x3f] sm:$0x4]   ;;  %v534_v27 = vsel %vm13_vm2, %v699_v22, %v530_v21 }
  0x30   :  { %v552_v28 = vsel %vm13_vm2, %v703_v24, %v548_v23  ;;  %v566_v29 = vsel %vm9_vm1, %v706_v26, %v562_v25  ;;  %v707_v30 = vld [vmem:[%s1264_s0 + $0x5e] sm:$0x8]   ;;  %s767_s0 = smov 12   ;;  %s769_s30 = smov 4   ;;  %vm33_vm4 = vcmask 1048544   ;;  %vm51_vm5 = vcmask 1015744  }
  0x31   :  { %v570_v31 = vsel %vm13_vm2, %v707_v30, %v566_v29  ;;  %vm69_vm6 = vcmask 982944   ;;  %vm87_vm7 = vcmask 950144   ;;  %vm105_vm8 = vcmask 917344  }
  0x32   :  { %427 = vrot.lane.b32.xlu0 %v426_v49, %s761_s24  ;;  %445 = vrot.lane.b32.xlu1 %v444_v53, %s762_s29  ;;  %s768_s29 = smov 8   ;;  %vm123_vm9 = vcmask 884544   ;;  %vm141_vm10 = vcmask 851744   ;;  %vm159_vm11 = vcmask 818944   ;;  %vm177_vm12 = vcmask 786144  }
  0x33   :  { %vm195_vm13 = vcmask 753344   ;;  %vm213_vm14 = vcmask 720544   ;;  %vm231_vm15 = vcmask 687744   ;;  %vm249_vm0 = vcmask 654944  }
  0x34   :  { %vm267_vm1 = vcmask 622144   ;;  %vm285_vm2 = vcmask 589344   ;;  %vm303_vm3 = vcmask 556544  }
  0x36   :  { %463 = vrot.lane.b32.xlu0 %v462_v3, %s763_s11  ;;  %481 = vrot.lane.b32.xlu1 %v480_v7, %s764_s18 }
  0x3a   :  { %499 = vrot.lane.b32.xlu0 %v498_v19, %s765_s25  ;;  %517 = vrot.lane.b32.xlu1 %v516_v20, %s766_s26 }
  0x3e   :  { %535 = vrot.lane.b32.xlu0 %v534_v27, %s767_s0  ;;  %553 = vrot.lane.b32.xlu1 %v552_v28, %s768_s29 }
  0x42   :  { %571 = vrot.lane.b32.xlu0 %v570_v31, %s769_s30 }
  0x78   :  { %v32_v32 = vpop.permute.xlu0 %31   ;;  %v68_v33 = vpop.permute.xlu1 %67  }
  0x79   :  { %34 = vst.msk [vmem:[#allocation0] sm:$0xf] %vm33_vm4, %v32_v32   ;;  %vm321_vm4 = vcmask 523744  }
  0x7c   :  { %v50_v34 = vpop.permute.xlu0 %49   ;;  %v86_v35 = vpop.permute.xlu1 %85  }
  0x7d   :  { %52 = vst.msk [vmem:[#allocation0] sm:$0xf] %vm51_vm5, %v50_v34   ;;  %vm339_vm5 = vcmask 490944  }
  0x7e   :  { %70 = vst.msk [vmem:[#allocation0] sm:$0xf] %vm69_vm6, %v68_v33   ;;  %vm357_vm6 = vcmask 458144  }
  0x7f   :  { %88 = vst.msk [vmem:[#allocation0] sm:$0xf] %vm87_vm7, %v86_v35   ;;  %vm375_vm7 = vcmask 425344  }
  0x80   :  { %v104_v36 = vpop.permute.xlu0 %103   ;;  %v122_v37 = vpop.permute.xlu1 %121  }
  0x81   :  { %106 = vst.msk [vmem:[#allocation0] sm:$0xf] %vm105_vm8, %v104_v36   ;;  %vm393_vm8 = vcmask 392544  }
  0x82   :  { %124 = vst.msk [vmem:[#allocation0] sm:$0xf] %vm123_vm9, %v122_v37   ;;  %vm411_vm9 = vcmask 359744  }
  0x84   :  { %v140_v38 = vpop.permute.xlu0 %139   ;;  %v158_v39 = vpop.permute.xlu1 %157  }
  0x85   :  { %142 = vst.msk [vmem:[#allocation0] sm:$0xf] %vm141_vm10, %v140_v38   ;;  %vm429_vm10 = vcmask 326944  }
  0x86   :  { %160 = vst.msk [vmem:[#allocation0] sm:$0xf] %vm159_vm11, %v158_v39   ;;  %vm447_vm11 = vcmask 294144  }
  0x88   :  { %v176_v40 = vpop.permute.xlu0 %175   ;;  %v194_v41 = vpop.permute.xlu1 %193  }
  0x89   :  { %178 = vst.msk [vmem:[#allocation0] sm:$0xf] %vm177_vm12, %v176_v40   ;;  %vm465_vm12 = vcmask 261344  }
  0x8a   :  { %196 = vst.msk [vmem:[#allocation0] sm:$0xf] %vm195_vm13, %v194_v41   ;;  %vm483_vm13 = vcmask 228544  }
  0x8c   :  { %v212_v42 = vpop.permute.xlu0 %211   ;;  %v230_v43 = vpop.permute.xlu1 %229  }
  0x8d   :  { %214 = vst.msk [vmem:[#allocation0] sm:$0xf] %vm213_vm14, %v212_v42   ;;  %vm501_vm14 = vcmask 195744  }
  0x8e   :  { %232 = vst.msk [vmem:[#allocation0] sm:$0xf] %vm231_vm15, %v230_v43   ;;  %vm519_vm15 = vcmask 162944  }
  0x90   :  { %v248_v44 = vpop.permute.xlu0 %247   ;;  %v266_v45 = vpop.permute.xlu1 %265  }
  0x91   :  { %250 = vst.msk [vmem:[#allocation0] sm:$0xf] %vm249_vm0, %v248_v44   ;;  %vm537_vm0 = vcmask 130144  }
  0x92   :  { %268 = vst.msk [vmem:[#allocation0] sm:$0xf] %vm267_vm1, %v266_v45   ;;  %vm555_vm1 = vcmask 97344  }
  0x94   :  { %v284_v46 = vpop.permute.xlu0 %283   ;;  %v302_v47 = vpop.permute.xlu1 %301  }
  0x95   :  { %286 = vst.msk [vmem:[#allocation0] sm:$0xf] %vm285_vm2, %v284_v46   ;;  %vm573_vm2 = vcmask 64544  }
  0x96   :  { %304 = vst.msk [vmem:[#allocation0] sm:$0xf] %vm303_vm3, %v302_v47  }
  0x98   :  { %v320_v48 = vpop.permute.xlu0 %319   ;;  %v338_v49 = vpop.permute.xlu1 %337  }
  0x99   :  { %322 = vst.msk [vmem:[#allocation0] sm:$0xf] %vm321_vm4, %v320_v48  }
  0x9a   :  { %340 = vst.msk [vmem:[#allocation0] sm:$0xf] %vm339_vm5, %v338_v49  }
  0x9c   :  { %v356_v50 = vpop.permute.xlu0 %355   ;;  %v374_v51 = vpop.permute.xlu1 %373  }
  0x9d   :  { %358 = vst.msk [vmem:[#allocation0] sm:$0xf] %vm357_vm6, %v356_v50  }
  0x9e   :  { %376 = vst.msk [vmem:[#allocation0] sm:$0xf] %vm375_vm7, %v374_v51  }
  0xa0   :  { %v392_v52 = vpop.permute.xlu0 %391   ;;  %v410_v53 = vpop.permute.xlu1 %409  }
  0xa1   :  { %394 = vst.msk [vmem:[#allocation0] sm:$0xf] %vm393_vm8, %v392_v52  }
  0xa2   :  { %412 = vst.msk [vmem:[#allocation0] sm:$0xf] %vm411_vm9, %v410_v53  }
  0xa4   :  { %v428_v54 = vpop.permute.xlu0 %427   ;;  %v446_v55 = vpop.permute.xlu1 %445  }
  0xa5   :  { %430 = vst.msk [vmem:[#allocation0] sm:$0xf] %vm429_vm10, %v428_v54  }
  0xa6   :  { %448 = vst.msk [vmem:[#allocation0] sm:$0xf] %vm447_vm11, %v446_v55  }
  0xa8   :  { %v464_v56 = vpop.permute.xlu0 %463   ;;  %v482_v57 = vpop.permute.xlu1 %481  }
  0xa9   :  { %466 = vst.msk [vmem:[#allocation0] sm:$0xf] %vm465_vm12, %v464_v56  }
  0xaa   :  { %484 = vst.msk [vmem:[#allocation0] sm:$0xf] %vm483_vm13, %v482_v57  }
  0xac   :  { %v500_v58 = vpop.permute.xlu0 %499   ;;  %v518_v59 = vpop.permute.xlu1 %517  }
  0xad   :  { %502 = vst.msk [vmem:[#allocation0] sm:$0xf] %vm501_vm14, %v500_v58  }
  0xae   :  { %520 = vst.msk [vmem:[#allocation0] sm:$0xf] %vm519_vm15, %v518_v59  }
  0xb0   :  { %v536_v60 = vpop.permute.xlu0 %535   ;;  %v554_v61 = vpop.permute.xlu1 %553  }
  0xb1   :  { %538 = vst.msk [vmem:[#allocation0] sm:$0xf] %vm537_vm0, %v536_v60  }
  0xb2   :  { %556 = vst.msk [vmem:[#allocation0] sm:$0xf] %vm555_vm1, %v554_v61  }
  0xb4   :  { %v572_v62 = vpop.permute.xlu0 %571  }
  0xb5   :  { %574 = vst.msk [vmem:[#allocation0] sm:$0xf] %vm573_vm2, %v572_v62  }
  0xbc   :  { %v578_v63 = vld [vmem:[#allocation0] sm:$0xf] }
  0xbd   :  { %580 = vst [vmem:[%s1265_s1] sm:$0xf] %v578_v63 }

// kernel: bayesian_detector_watermarked_likelihood.1
= control target key start
LH: loop header
LB: loop body
LE: loop exit
PB: predicated region body
PF: predicated region fallthrough
CT: control target
= control target key end

     0   :  { %s54_s11 = smov 1   ;;  %s55_s12 = smov 3   ;;  %s90_s0 = inlined_call_operand.vmem [shape: s8[1,128], index: 0, kind: input, shape index: {}]   ;;  %s91_s1 = inlined_call_operand.vmem [shape: f32[4,128], index: 1, kind: input, shape index: {}]   ;;  %s92_s2 = inlined_call_operand.vmem [shape: f32[1,128], index: 2, kind: output, shape index: {}]  }
   0x1   :  { %v11_v0 = vld [vmem:[%s90_s0] sm:$0x1]  ;;  %s56_s13 = smov 2   ;;  %v15_v3 = vld [vmem:[%s91_s1 + $0x1] sm:$0x1] }
   0x2   :  { %v12_v1 = vunpack.c.0.s8 %v11_v0  ;;  %v14_v6 = vld [vmem:[%s91_s1] sm:$0x1]  ;;  %v20_v7 = vld [vmem:[%s91_s1 + $0x2] sm:$0x1]  ;;  %v25_v8 = vld [vmem:[%s91_s1 + $0x3] sm:$0x1] }
   0x4   :  { %v13_v2 = vcvt.s32.f32 %v12_v1 }
   0x6   :  { %16 = vrot.lane.b32.xlu0 %v13_v2, %s54_s11  ;;  %26 = vrot.lane.b32.xlu1 %v13_v2, %s55_s12  ;;  %v36_v19 = vmul.f32 0.5, %v13_v2 }
   0x8   :  { %v46_v20 = vadd.f32 -0.25, %v36_v19 }
   0xa   :  { %21 = vrot.lane.b32.xlu0 %v13_v2, %s56_s13 }
  0x78   :  { %v17_v4 = vpop.permute.xlu0 %16  ;;  %v27_v9 = vpop.permute.xlu1 %26 }
  0x79   :  { %v18_v5 = vmul.f32 %v17_v4, %v15_v3  ;;  %v28_v13 = vmul.f32 %v27_v9, %v25_v8 }
  0x7b   :  { %v19_v11 = vadd.f32 %v18_v5, %v14_v6 }
  0x7c   :  { %v22_v10 = vpop.permute.xlu0 %21 }
  0x7d   :  { %v23_v12 = vmul.f32 %v22_v10, %v20_v7 }
  0x7f   :  { %v24_v14 = vadd.f32 %v23_v12, %v19_v11 }
  0x81   :  { %v29_v15 = vadd.f32 %v28_v13, %v24_v14 }
  0x83   :  { %v45_v16 = vmul.f32 -1.442695, %v29_v15 }
  0x85   :  { %50 = vpow2.f32 %v45_v16 }
  0x8f   :  { %v51_v17 = vpop.eup %50 }
  0x90   :  { %v33_v18 = vadd.f32 1.0, %v51_v17 }
  0x92   :  { %52 = vrcp.f32 %v33_v18 }
  0x9c   :  { %v53_v21 = vpop.eup %52 }
  0x9d   :  { %v38_v22 = vmul.f32 %v53_v21, %v46_v20 }
  0x9f   :  { %v39_v23 = vadd.f32 0.5, %v38_v22 }
  0xa1   :  { %40 = vst [vmem:[%s92_s2] sm:$0x1] %v39_v23 }

</bundles_post_ra>
